<compile_context>
chip_gen: v6e
topology: v6e:2x2x1
jax: 0.10.0
libtpu: 0.0.40
codegen_flags: <defaults>
</compile_context>

<pallas_src>
import functools

import jax
import jax.numpy as jnp
from jax.experimental import pallas as pl
from jax.experimental.pallas import tpu as pltpu


def _round_up(n: int, m: int) -> int:
    return ((n + m - 1) // m) * m


def dqn_kernel(x_ref, w1_ref, b1_ref, w2_ref, b2_ref, w3_ref, b3_ref, out_ref):
    """One batch tile (batch on lanes): fused 3-layer MLP, f32 MXU accumulation.

    Shapes (per tile): x (k_pad, T), w1 (H, k_pad), w2 (H, H), w3 (n_pad, H),
    biases (rows, 1) broadcast along lanes, out (n_pad, T).
    """
    cdt = w1_ref.dtype                       # bf16 or f32 matmul-input dtype
    x = x_ref[...]                           # already cast in the wrapper

    h1 = jnp.dot(w1_ref[...], x, preferred_element_type=jnp.float32) + b1_ref[...]
    h1 = jnp.maximum(h1, 0.0).astype(cdt)    # ReLU/bias in f32, narrow for next dot

    h2 = jnp.dot(w2_ref[...], h1, preferred_element_type=jnp.float32) + b2_ref[...]
    h2 = jnp.maximum(h2, 0.0).astype(cdt)

    out_ref[...] = (
        jnp.dot(w3_ref[...], h2, preferred_element_type=jnp.float32) + b3_ref[...]
    ).astype(out_ref.dtype)


def prepare_params(torch_params, *, use_bf16: bool = True):
    """One-time prep: pad/cast PyTorch-layout params ((out,in) weights, (out,) biases).

    Returns kernel-ready params:
      w1 (H, k_pad) cdt, b1 (H, 1) f32, w2 (H, H) cdt, b2 (H, 1) f32,
      w3 (n_pad, H) cdt, b3 (n_pad, 1) f32
    Do this once when the net is created — NOT in the per-step forward.
    """
    cdt = jnp.bfloat16 if use_bf16 else jnp.float32
    w1 = jnp.asarray(torch_params["w1"], jnp.float32)      # (H, n_states)
    w2 = jnp.asarray(torch_params["w2"], jnp.float32)      # (H, H)
    w3 = jnp.asarray(torch_params["w3"], jnp.float32)      # (n_actions, H)
    H, n_states = w1.shape
    n_actions = w3.shape[0]

    k_pad = max(_round_up(n_states, 8), 8)                 # sublane multiple
    n_pad = max(_round_up(n_actions, 8), 8)                # sublane multiple

    return {
        "w1": jnp.zeros((H, k_pad), jnp.float32).at[:, :n_states].set(w1).astype(cdt),
        "b1": jnp.asarray(torch_params["b1"], jnp.float32).reshape(H, 1),
        "w2": w2.astype(cdt),
        "b2": jnp.asarray(torch_params["b2"], jnp.float32).reshape(H, 1),
        "w3": jnp.zeros((n_pad, H), jnp.float32).at[:n_actions, :].set(w3).astype(cdt),
        "b3": jnp.zeros((n_pad, 1), jnp.float32)
              .at[:n_actions, :].set(jnp.asarray(torch_params["b3"], jnp.float32)
                                     .reshape(n_actions, 1)),
    }


@functools.partial(jax.jit, static_argnames=("n_actions", "tile_b"))
def dqn_forward(x, prep, n_actions: int, *, tile_b: int = 1024):
    """x: (B, n_states) f32.  prep: output of prepare_params.  Returns (B, n_actions) f32."""
    B, n_states = x.shape
    w1, b1, w2, b2, w3, b3 = (prep[k] for k in ("w1", "b1", "w2", "b2", "w3", "b3"))
    H, k_pad = w1.shape
    n_pad = w3.shape[0]
    cdt = w1.dtype

    # Batch goes on the lane axis -> tile must be a multiple of 128.
    b_pad0 = _round_up(max(B, 128), 128)
    tile = min(_round_up(tile_b, 128), b_pad0)
    b_pad = _round_up(b_pad0, tile)
    num_tiles = b_pad // tile

    # Transpose + zero-pad x once, casting to the matmul input dtype
    # (padded K rows / batch columns are zero, so the math is unchanged).
    xt = jnp.zeros((k_pad, b_pad), cdt).at[:n_states, :B].set(x.T.astype(cdt))

    out_t = pl.pallas_call(
        dqn_kernel,
        out_shape=jax.ShapeDtypeStruct((n_pad, b_pad), jnp.float32),
        grid=(num_tiles,),
        in_specs=[
            pl.BlockSpec((k_pad, tile), lambda i: (0, i)),  # x.T: streamed per batch tile
            pl.BlockSpec((H, k_pad), lambda i: (0, 0)),     # w1: VMEM-resident
            pl.BlockSpec((H, 1), lambda i: (0, 0)),         # b1
            pl.BlockSpec((H, H), lambda i: (0, 0)),         # w2
            pl.BlockSpec((H, 1), lambda i: (0, 0)),         # b2
            pl.BlockSpec((n_pad, H), lambda i: (0, 0)),     # w3
            pl.BlockSpec((n_pad, 1), lambda i: (0, 0)),     # b3
        ],
        out_specs=pl.BlockSpec((n_pad, tile), lambda i: (0, i)),  # (8, tile): tiny writeback
        compiler_params=pltpu.CompilerParams(
            dimension_semantics=("parallel",),              # v7x: 2 TCs split batch tiles
        ),
    )(xt, w1, b1, w2, b2, w3, b3)

    return out_t[:n_actions, :B].T


def init_params(key, n_states, n_actions):
    """Deterministic synthetic init in PyTorch Linear layout: W (out,in), b (out,)."""
    ks = jax.random.split(key, 6)

    def lin(kw, kb, fan_in, fan_out):
        bound = 1.0 / jnp.sqrt(fan_in)
        w = jax.random.uniform(kw, (fan_out, fan_in), jnp.float32, -bound, bound)
        b = jax.random.uniform(kb, (fan_out,), jnp.float32, -bound, bound)
        return w, b

    w1, b1 = lin(ks[0], ks[1], n_states, 128)
    w2, b2 = lin(ks[2], ks[3], 128, 128)
    w3, b3 = lin(ks[4], ks[5], 128, n_actions)
    return {"w1": w1, "b1": b1, "w2": w2, "b2": b2, "w3": w3, "b3": b3}


def dqn_reference(x, p):
    h1 = jnp.maximum(x @ p["w1"].T + p["b1"], 0.0)
    h2 = jnp.maximum(h1 @ p["w2"].T + p["b2"], 0.0)
    return h2 @ p["w3"].T + p["b3"]


if __name__ == "__main__":
    key = jax.random.PRNGKey(0)
    k_x, k_p = jax.random.split(key)

    batch, n_states, n_actions = 8, 4, 2      # CartPole-style dims
    x = jax.random.normal(k_x, (batch, n_states), dtype=jnp.float32)
    params = init_params(k_p, n_states, n_actions)
    ref = dqn_reference(x, params)

    # f32 matmul path (bit-faithful to the PyTorch forward) — tight tolerance.
    prep_f32 = prepare_params(params, use_bf16=False)
    out = jax.block_until_ready(dqn_forward(x, prep_f32, n_actions))
    assert out.shape == (batch, n_actions)
    assert jnp.allclose(out, ref, atol=1e-5, rtol=1e-5)

    # Default bf16-matmul path (MXU-native on v5e/v6e/v7x), f32 accumulation.
    prep_bf16 = prepare_params(params, use_bf16=True)
    out_bf16 = jax.block_until_ready(dqn_forward(x, prep_bf16, n_actions))
    assert out_bf16.shape == (batch, n_actions)
    assert jnp.allclose(out_bf16, ref, atol=1e-1, rtol=5e-2)
    # Greedy action choice should be insensitive to bf16 rounding here.
    assert jnp.array_equal(jnp.argmax(out_bf16, axis=-1), jnp.argmax(ref, axis=-1))

    # Larger, non-aligned batch exercising the multi-tile / pipelined path
    # (tile=256 -> 4 tiles; on v7x pass tile_b ~= cdiv(B,2) rounded to 128 instead).
    xb = jax.random.normal(k_x, (1000, n_states), dtype=jnp.float32)
    out_b = jax.block_until_ready(dqn_forward(xb, prep_f32, n_actions, tile_b=256))
    ref_b = dqn_reference(xb, params)
    assert out_b.shape == (1000, n_actions)
    assert jnp.allclose(out_b, ref_b, atol=1e-4, rtol=1e-4)

    print("KERNEL_OK")
</pallas_src>

<mosaic_0001>
module attributes {stable_mosaic.version = 11 : i64} {
  func.func @dqn_kernel(%arg0: i32, %arg1: memref<8x128xf32, #tpu.memory_space<vmem>>, %arg2: memref<128x8xf32, #tpu.memory_space<vmem>>, %arg3: memref<128x1xf32, #tpu.memory_space<vmem>>, %arg4: memref<128x128xf32, #tpu.memory_space<vmem>>, %arg5: memref<128x1xf32, #tpu.memory_space<vmem>>, %arg6: memref<8x128xf32, #tpu.memory_space<vmem>>, %arg7: memref<8x1xf32, #tpu.memory_space<vmem>>, %arg8: memref<8x128xf32, #tpu.memory_space<vmem>>) attributes {dimension_semantics = [#tpu.dimension_semantics<parallel>], iteration_bounds = array<i64: 1>, scalar_prefetch = 0 : i64, scratch_operands = 0 : i64, tpu.core_type = #tpu.core_type<tc>, window_params = [{transform_indices = @transform_0, window_bounds = array<i64: 8, 128>}, {pipeline_mode = #tpu.pipeline_mode<synchronous>, transform_indices = @transform_1, window_bounds = array<i64: 128, 8>}, {pipeline_mode = #tpu.pipeline_mode<synchronous>, transform_indices = @transform_2, window_bounds = array<i64: 128, 1>}, {pipeline_mode = #tpu.pipeline_mode<synchronous>, transform_indices = @transform_3, window_bounds = array<i64: 128, 128>}, {pipeline_mode = #tpu.pipeline_mode<synchronous>, transform_indices = @transform_4, window_bounds = array<i64: 128, 1>}, {pipeline_mode = #tpu.pipeline_mode<synchronous>, transform_indices = @transform_5, window_bounds = array<i64: 8, 128>}, {pipeline_mode = #tpu.pipeline_mode<synchronous>, transform_indices = @transform_6, window_bounds = array<i64: 8, 1>}, {transform_indices = @transform_7, window_bounds = array<i64: 8, 128>}]} {
    %c0 = arith.constant 0 : index
    %c0_0 = arith.constant 0 : index
    %0 = vector.load %arg1[%c0, %c0_0] : memref<8x128xf32, #tpu.memory_space<vmem>>, vector<8x128xf32>
    %c0_1 = arith.constant 0 : index
    %c0_2 = arith.constant 0 : index
    %1 = vector.load %arg2[%c0_1, %c0_2] : memref<128x8xf32, #tpu.memory_space<vmem>>, vector<128x8xf32>
    %cst = arith.constant dense<0.000000e+00> : vector<128x128xf32>
    %2 = tpu.matmul %1, %0, %cst {dimension_numbers = #tpu.dot_dimension_numbers<[1], [0], [0], [1], [0, 0, 1, 1], [], []>} : vector<128x8xf32>, vector<8x128xf32>, vector<128x128xf32> -> vector<128x128xf32>
    %c0_3 = arith.constant 0 : index
    %c0_4 = arith.constant 0 : index
    %3 = vector.load %arg3[%c0_3, %c0_4] : memref<128x1xf32, #tpu.memory_space<vmem>>, vector<128x1xf32>
    %4 = vector.broadcast %3 : vector<128x1xf32> to vector<128x128xf32>
    %5 = arith.addf %2, %4 : vector<128x128xf32>
    %cst_5 = arith.constant 0.000000e+00 : f32
    %6 = vector.broadcast %cst_5 : f32 to vector<128x128xf32>
    %7 = arith.maximumf %5, %6 : vector<128x128xf32>
    %c0_6 = arith.constant 0 : index
    %c0_7 = arith.constant 0 : index
    %8 = vector.load %arg4[%c0_6, %c0_7] : memref<128x128xf32, #tpu.memory_space<vmem>>, vector<128x128xf32>
    %cst_8 = arith.constant dense<0.000000e+00> : vector<128x128xf32>
    %9 = tpu.matmul %8, %7, %cst_8 {dimension_numbers = #tpu.dot_dimension_numbers<[1], [0], [0], [1], [0, 0, 1, 1], [], []>} : vector<128x128xf32>, vector<128x128xf32>, vector<128x128xf32> -> vector<128x128xf32>
    %c0_9 = arith.constant 0 : index
    %c0_10 = arith.constant 0 : index
    %10 = vector.load %arg5[%c0_9, %c0_10] : memref<128x1xf32, #tpu.memory_space<vmem>>, vector<128x1xf32>
    %11 = vector.broadcast %10 : vector<128x1xf32> to vector<128x128xf32>
    %12 = arith.addf %9, %11 : vector<128x128xf32>
    %cst_11 = arith.constant 0.000000e+00 : f32
    %13 = vector.broadcast %cst_11 : f32 to vector<128x128xf32>
    %14 = arith.maximumf %12, %13 : vector<128x128xf32>
    %c0_12 = arith.constant 0 : index
    %c0_13 = arith.constant 0 : index
    %15 = vector.load %arg6[%c0_12, %c0_13] : memref<8x128xf32, #tpu.memory_space<vmem>>, vector<8x128xf32>
    %cst_14 = arith.constant dense<0.000000e+00> : vector<8x128xf32>
    %16 = tpu.matmul %15, %14, %cst_14 {dimension_numbers = #tpu.dot_dimension_numbers<[1], [0], [0], [1], [0, 0, 1, 1], [], []>} : vector<8x128xf32>, vector<128x128xf32>, vector<8x128xf32> -> vector<8x128xf32>
    %c0_15 = arith.constant 0 : index
    %c0_16 = arith.constant 0 : index
    %17 = vector.load %arg7[%c0_15, %c0_16] : memref<8x1xf32, #tpu.memory_space<vmem>>, vector<8x1xf32>
    %18 = vector.broadcast %17 : vector<8x1xf32> to vector<8x128xf32>
    %19 = arith.addf %16, %18 : vector<8x128xf32>
    %c0_17 = arith.constant 0 : index
    %c0_18 = arith.constant 0 : index
    %20 = vector.load %arg8[%c0_17, %c0_18] : memref<8x128xf32, #tpu.memory_space<vmem>>, vector<8x128xf32>
    tpu.vector_store %arg8[%c0_17, %c0_18], %19 {strides = array<i32>} : memref<8x128xf32, #tpu.memory_space<vmem>>, vector<8x128xf32>,
    return
  }
  func.func @transform_0(%arg0: i32) -> (i32, i32) {
    %c0_i32 = arith.constant 0 : i32
    %c0_i32_0 = arith.constant 0 : i32
    return %c0_i32, %arg0 : i32, i32
  }
  func.func @transform_1(%arg0: i32) -> (i32, i32) {
    %c0_i32 = arith.constant 0 : i32
    %c0_i32_0 = arith.constant 0 : i32
    %c0_i32_1 = arith.constant 0 : i32
    return %c0_i32, %c0_i32_0 : i32, i32
  }
  func.func @transform_2(%arg0: i32) -> (i32, i32) {
    %c0_i32 = arith.constant 0 : i32
    %c0_i32_0 = arith.constant 0 : i32
    %c0_i32_1 = arith.constant 0 : i32
    return %c0_i32, %c0_i32_0 : i32, i32
  }
  func.func @transform_3(%arg0: i32) -> (i32, i32) {
    %c0_i32 = arith.constant 0 : i32
    %c0_i32_0 = arith.constant 0 : i32
    %c0_i32_1 = arith.constant 0 : i32
    return %c0_i32, %c0_i32_0 : i32, i32
  }
  func.func @transform_4(%arg0: i32) -> (i32, i32) {
    %c0_i32 = arith.constant 0 : i32
    %c0_i32_0 = arith.constant 0 : i32
    %c0_i32_1 = arith.constant 0 : i32
    return %c0_i32, %c0_i32_0 : i32, i32
  }
  func.func @transform_5(%arg0: i32) -> (i32, i32) {
    %c0_i32 = arith.constant 0 : i32
    %c0_i32_0 = arith.constant 0 : i32
    %c0_i32_1 = arith.constant 0 : i32
    return %c0_i32, %c0_i32_0 : i32, i32
  }
  func.func @transform_6(%arg0: i32) -> (i32, i32) {
    %c0_i32 = arith.constant 0 : i32
    %c0_i32_0 = arith.constant 0 : i32
    %c0_i32_1 = arith.constant 0 : i32
    return %c0_i32, %c0_i32_0 : i32, i32
  }
  func.func @transform_7(%arg0: i32) -> (i32, i32) {
    %c0_i32 = arith.constant 0 : i32
    %c0_i32_0 = arith.constant 0 : i32
    return %c0_i32, %arg0 : i32, i32
  }
}

</mosaic_0001>

<bundles_post_ra>
// kernel: dqn_forward.1
= control target key start
LH: loop header
LB: loop body
LE: loop exit
PB: predicated region body
PF: predicated region fallthrough
CT: control target
= control target key end

     0   :  { %vm139_vm0 = vcmask 64512   ;;  %v908_v3 = vmov 0   ;;  %vm910_vm1 = vmmov 0   ;;  %s1212_s0 = inlined_call_operand.vmem [shape: f32[8,128], index: 0, kind: input, shape index: {}]   ;;  %s1213_s1 = inlined_call_operand.vmem [shape: f32[128,8], index: 1, kind: input, shape index: {}]   ;;  %s1214_s2 = inlined_call_operand.vmem [shape: f32[128,1], index: 2, kind: input, shape index: {}]   ;;  %s1215_s4 = inlined_call_operand.vmem [shape: f32[128,1], index: 4, kind: input, shape index: {}]   ;;  %s1216_s6 = inlined_call_operand.vmem [shape: f32[8,1], index: 6, kind: input, shape index: {}]   ;;  %s1217_s3 = inlined_call_operand.vmem [shape: f32[128,128], index: 3, kind: input, shape index: {}]   ;;  %s1218_s5 = inlined_call_operand.vmem [shape: f32[8,128], index: 5, kind: input, shape index: {}]   ;;  %s1219_s7 = inlined_call_operand.vmem [shape: f32[8,128], index: 7, kind: output, shape index: {}]  }
   0x1   :  { %v26_v0 = vld [vmem:[%s1212_s0] sm:$0xff]  ;;  %v28_v2 = vld [vmem:[%s1213_s1 + $0x8] sm:$0xff]  ;;  %906 = vset.pattern.permute.xlu0 %v908_v3  ;;  %907 = vset.pattern.permute.xlu1 %v908_v3  ;;  %v29_v4 = vld [vmem:[%s1213_s1 + $0x10] sm:$0xff] }
   0x2   :  { %v27_v1 = vld [vmem:[%s1213_s1] sm:$0xff]  ;;  %786 = vmatprep.subr.mxu0 %v26_v0  ;;  %v30_v5 = vld [vmem:[%s1213_s1 + $0x18] sm:$0xff]  ;;  %v56_v8 = vld [vmem:[%s1214_s2 + $0x68] sm:$0xff] }
   0x3   :  { %788 = vmatprep.mubr.msk.f32.mxu0 %vm139_vm0, %v27_v1  ;;  %787 = vmatpush3.msra.mxu0 %v26_v0  ;;  %v31_v6 = vld [vmem:[%s1213_s1 + $0x20] sm:$0xff]  ;;  %v58_v7 = vld [vmem:[%s1214_s2 + $0x78] sm:$0xff]  ;;  %v57_v9 = vld [vmem:[%s1214_s2 + $0x70] sm:$0xff] }
   0x4   :  { %789 = vmatmul.mubr.msk.f32.vlgmr.msra.gmra.mxu0 %vm139_vm0, %v28_v2  ;;  %136 = vperm.xlu0 %906, %v58_v7   ;;  %v32_v10 = vld [vmem:[%s1213_s1 + $0x28] sm:$0xff]  ;;  %v55_v11 = vld [vmem:[%s1214_s2 + $0x60] sm:$0xff]  ;;  %v33_v12 = vld [vmem:[%s1213_s1 + $0x30] sm:$0xff] }
   0x5   :  { %791 = vmatprep.mubr.msk.f32.mxu0 %vm139_vm0, %v29_v4  ;;  %126 = vperm.xlu1 %907, %v56_v8   ;;  %v54_v13 = vld [vmem:[%s1214_s2 + $0x58] sm:$0xff]  ;;  %v53_v15 = vld [vmem:[%s1214_s2 + $0x50] sm:$0xff]  ;;  %v35_v16 = vld [vmem:[%s1213_s1 + $0x40] sm:$0xff] }
   0x6   :  { %v34_v14 = vld [vmem:[%s1213_s1 + $0x38] sm:$0xff]  ;;  %v52_v17 = vld [vmem:[%s1214_s2 + $0x48] sm:$0xff]  ;;  %v51_v19 = vld [vmem:[%s1214_s2 + $0x40] sm:$0xff] }
   0x7   :  { %v36_v18 = vld [vmem:[%s1213_s1 + $0x48] sm:$0xff]  ;;  %v37_v20 = vld [vmem:[%s1213_s1 + $0x50] sm:$0xff]  ;;  %v50_v21 = vld [vmem:[%s1214_s2 + $0x38] sm:$0xff] }
   0x8   :  { %792 = vmatmul.mubr.msk.f32.gmra.mxu0 %vm139_vm0, %v30_v5  ;;  %131 = vperm.xlu0 %906, %v57_v9   ;;  %v38_v22 = vld [vmem:[%s1213_s1 + $0x58] sm:$0xff]  ;;  %v49_v23 = vld [vmem:[%s1214_s2 + $0x30] sm:$0xff]  ;;  %v39_v24 = vld [vmem:[%s1213_s1 + $0x60] sm:$0xff] }
   0x9   :  { %794 = vmatprep.mubr.msk.f32.mxu0 %vm139_vm0, %v31_v6  ;;  %121 = vperm.xlu1 %907, %v55_v11   ;;  %v48_v25 = vld [vmem:[%s1214_s2 + $0x28] sm:$0xff]  ;;  %v47_v27 = vld [vmem:[%s1214_s2 + $0x20] sm:$0xff]  ;;  %v41_v28 = vld [vmem:[%s1213_s1 + $0x70] sm:$0xff] }
   0xa   :  { %v40_v26 = vld [vmem:[%s1213_s1 + $0x68] sm:$0xff]  ;;  %v46_v29 = vld [vmem:[%s1214_s2 + $0x18] sm:$0xff]  ;;  %v45_v31 = vld [vmem:[%s1214_s2 + $0x10] sm:$0xff] }
   0xb   :  { %v42_v30 = vld [vmem:[%s1213_s1 + $0x78] sm:$0xff]  ;;  %v44_v32 = vld [vmem:[%s1214_s2 + $0x8] sm:$0xff]  ;;  %v43_v33 = vld [vmem:[%s1214_s2] sm:$0xff] }
   0xc   :  { %795 = vmatmul.mubr.msk.f32.gmra.mxu0 %vm139_vm0, %v32_v10  ;;  %116 = vperm.xlu0 %906, %v54_v13   ;;  %v380_v34 = vld [vmem:[%s1215_s4 + $0x78] sm:$0xff]  ;;  %v379_v35 = vld [vmem:[%s1215_s4 + $0x70] sm:$0xff]  ;;  %v378_v36 = vld [vmem:[%s1215_s4 + $0x68] sm:$0xff] }
   0xd   :  { %797 = vmatprep.mubr.msk.f32.mxu0 %vm139_vm0, %v33_v12  ;;  %111 = vperm.xlu1 %907, %v53_v15   ;;  %v377_v37 = vld [vmem:[%s1215_s4 + $0x60] sm:$0xff]  ;;  %v376_v38 = vld [vmem:[%s1215_s4 + $0x58] sm:$0xff]  ;;  %v375_v39 = vld [vmem:[%s1215_s4 + $0x50] sm:$0xff] }
   0xe   :  { %v374_v40 = vld [vmem:[%s1215_s4 + $0x48] sm:$0xff]  ;;  %v373_v41 = vld [vmem:[%s1215_s4 + $0x40] sm:$0xff]  ;;  %v372_v42 = vld [vmem:[%s1215_s4 + $0x38] sm:$0xff] }
   0xf   :  { %v371_v43 = vld [vmem:[%s1215_s4 + $0x30] sm:$0xff]  ;;  %v370_v44 = vld [vmem:[%s1215_s4 + $0x28] sm:$0xff]  ;;  %v369_v45 = vld [vmem:[%s1215_s4 + $0x20] sm:$0xff] }
  0x10   :  { %798 = vmatmul.mubr.msk.f32.gmra.mxu0 %vm139_vm0, %v34_v14  ;;  %106 = vperm.xlu0 %906, %v52_v17   ;;  %v368_v46 = vld [vmem:[%s1215_s4 + $0x18] sm:$0xff]  ;;  %v367_v47 = vld [vmem:[%s1215_s4 + $0x10] sm:$0xff]  ;;  %v366_v48 = vld [vmem:[%s1215_s4 + $0x8] sm:$0xff] }
  0x11   :  { %800 = vmatprep.mubr.msk.f32.mxu0 %vm139_vm0, %v35_v16  ;;  %101 = vperm.xlu1 %907, %v51_v19   ;;  %v365_v49 = vld [vmem:[%s1215_s4] sm:$0xff] }
  0x12   :  { %v623_v50 = vld [vmem:[%s1216_s6] sm:$0xff] }
  0x13   :  { %v349_v51 = vld [vmem:[%s1217_s3] sm:$0xff] }
  0x14   :  { %801 = vmatmul.mubr.msk.f32.gmra.mxu0 %vm139_vm0, %v36_v18  ;;  %96 = vperm.xlu0 %906, %v50_v21  }
  0x15   :  { %803 = vmatprep.mubr.msk.f32.mxu0 %vm139_vm0, %v37_v20  ;;  %91 = vperm.xlu1 %907, %v49_v23  }
  0x16   :  { %844 = vmatprep.mubr.f32.mxu1 %v349_v51 }
  0x18   :  { %804 = vmatmul.mubr.msk.f32.gmra.mxu0 %vm139_vm0, %v38_v22  ;;  %86 = vperm.xlu0 %906, %v48_v25  }
  0x19   :  { %806 = vmatprep.mubr.msk.f32.mxu0 %vm139_vm0, %v39_v24  ;;  %81 = vperm.xlu1 %907, %v47_v27  }
  0x1c   :  { %807 = vmatmul.mubr.msk.f32.gmra.mxu0 %vm139_vm0, %v40_v26  ;;  %76 = vperm.xlu0 %906, %v46_v29  }
  0x1d   :  { %809 = vmatprep.mubr.msk.f32.mxu0 %vm139_vm0, %v41_v28  ;;  %71 = vperm.xlu1 %907, %v45_v31  }
  0x20   :  { %810 = vmatmul.mubr.msk.f32.gmra.mxu0 %vm139_vm0, %v42_v30  ;;  %66 = vperm.xlu0 %906, %v44_v32  }
  0x21   :  { %61 = vperm.xlu1 %907, %v43_v33  }
  0x24   :  { %458 = vperm.xlu0 %906, %v380_v34  }
  0x25   :  { %453 = vperm.xlu1 %907, %v379_v35  }
  0x28   :  { %448 = vperm.xlu0 %906, %v378_v36  }
  0x29   :  { %443 = vperm.xlu1 %907, %v377_v37  }
  0x2c   :  { %438 = vperm.xlu0 %906, %v376_v38  }
  0x2d   :  { %433 = vperm.xlu1 %907, %v375_v39  }
  0x30   :  { %428 = vperm.xlu0 %906, %v374_v40  }
  0x31   :  { %423 = vperm.xlu1 %907, %v373_v41  }
  0x34   :  { %418 = vperm.xlu0 %906, %v372_v42  }
  0x35   :  { %413 = vperm.xlu1 %907, %v371_v43  }
  0x38   :  { %408 = vperm.xlu0 %906, %v370_v44  }
  0x39   :  { %403 = vperm.xlu1 %907, %v369_v45  }
  0x3c   :  { %398 = vperm.xlu0 %906, %v368_v46  }
  0x3d   :  { %393 = vperm.xlu1 %907, %v367_v47  }
  0x40   :  { %388 = vperm.xlu0 %906, %v366_v48  }
  0x41   :  { %383 = vperm.xlu1 %907, %v365_v49  }
  0x44   :  { %626 = vperm.xlu0 %906, %v623_v50  }
  0x7f   :  { %v137_v58 = vpop.permute.xlu0 %136 }
  0x80   :  { %v127_v60 = vpop.permute.xlu1 %126 }
  0x83   :  { %v132_v63 = vpop.permute.xlu0 %131 }
  0x84   :  { %v122_v1 = vpop.permute.xlu1 %121 }
  0x87   :  { %v117_v4 = vpop.permute.xlu0 %116 }
  0x88   :  { %v112_v6 = vpop.permute.xlu1 %111 }
  0x8b   :  { %v107_v10 = vpop.permute.xlu0 %106 }
  0x8c   :  { %v102_v15 = vpop.permute.xlu1 %101 }
  0x8f   :  { %v97_v20 = vpop.permute.xlu0 %96 }
  0x90   :  { %v92_v23 = vpop.permute.xlu1 %91 }
  0x93   :  { %v87_v28 = vpop.permute.xlu0 %86 }
  0x94   :  { %v82_v31 = vpop.permute.xlu1 %81 }
  0x97   :  { %v77_v36 = vpop.permute.xlu0 %76 }
  0x98   :  { %v72_v39 = vpop.permute.xlu1 %71 }
  0x9b   :  { %v67_v44 = vpop.permute.xlu0 %66 }
  0x9c   :  { %v62_v47 = vpop.permute.xlu1 %61 }
  0xc4   :  { %v1120_v52 = vpop.f32.mrf.mxu0 }
  0xc5   :  { %v260_v45 = vadd.f32 %v1120_v52, %v67_v44  ;;  %v351_v52 = vld [vmem:[%s1217_s3 + $0x10] sm:$0xff] }
  0xc6   :  { %v1122_v53 = vpop.f32.mrf.mxu0 }
  0xc7   :  { %v255_v48 = vadd.f32 %v1122_v53, %v62_v47  ;;  %v334_v50 = vmax.f32 %v260_v45, 0.0  ;;  %v352_v53 = vld [vmem:[%s1217_s3 + $0x18] sm:$0xff] }
  0xc8   :  { %v1124_v54 = vpop.f32.mrf.mxu0 }
  0xc9   :  { %v270_v40 = vadd.f32 %v1124_v54, %v77_v36  ;;  %v333_v51 = vmax.f32 %v255_v48, 0.0  ;;  %v350_v54 = vld [vmem:[%s1217_s3 + $0x8] sm:$0xff] }
  0xca   :  { %v1126_v55 = vpop.f32.mrf.mxu0 }
  0xcb   :  { %v265_v42 = vadd.f32 %v1126_v55, %v72_v39  ;;  %v336_v46 = vmax.f32 %v270_v40, 0.0  ;;  %v353_v55 = vld [vmem:[%s1217_s3 + $0x20] sm:$0xff] }
  0xcc   :  { %v796_v56 = vpop.f32.mrf.mxu0 }
  0xcd   :  { %v280_v34 = vadd.f32 %v796_v56, %v87_v28  ;;  %v335_v49 = vmax.f32 %v265_v42, 0.0  ;;  %v354_v56 = vld [vmem:[%s1217_s3 + $0x28] sm:$0xff] }
  0xce   :  { %v274_v57 = vpop.f32.mrf.mxu0 }
  0xcf   :  { %v275_v37 = vadd.f32 %v274_v57, %v82_v31  ;;  %v338_v41 = vmax.f32 %v280_v34, 0.0  ;;  %v355_v57 = vld [vmem:[%s1217_s3 + $0x30] sm:$0xff] }
  0xd0   :  { %v799_v59 = vpop.f32.mrf.mxu0 }
  0xd1   :  { %v290_v29 = vadd.f32 %v799_v59, %v97_v20  ;;  %v337_v43 = vmax.f32 %v275_v37, 0.0  ;;  %v357_v59 = vld [vmem:[%s1217_s3 + $0x40] sm:$0xff] }
  0xd2   :  { %v284_v61 = vpop.f32.mrf.mxu0 }
  0xd3   :  { %v285_v32 = vadd.f32 %v284_v61, %v92_v23  ;;  %v340_v35 = vmax.f32 %v290_v29, 0.0  ;;  %v359_v61 = vld [vmem:[%s1217_s3 + $0x50] sm:$0xff] }
  0xd4   :  { %v802_v62 = vpop.f32.mrf.mxu0 }
  0xd5   :  { %v300_v24 = vadd.f32 %v802_v62, %v107_v10  ;;  %v339_v38 = vmax.f32 %v285_v32, 0.0  ;;  %v360_v62 = vld [vmem:[%s1217_s3 + $0x58] sm:$0xff]  ;;  %v459_v10 = vpop.permute.xlu0 %458 }
  0xd6   :  { %v294_v0 = vpop.f32.mrf.mxu0 }
  0xd7   :  { %v295_v26 = vadd.f32 %v294_v0, %v102_v15  ;;  %v342_v30 = vmax.f32 %v300_v24, 0.0  ;;  %v362_v0 = vld [vmem:[%s1217_s3 + $0x68] sm:$0xff] }
  0xd8   :  { %v805_v2 = vpop.f32.mrf.mxu0 }
  0xd9   :  { %v310_v18 = vadd.f32 %v805_v2, %v117_v4  ;;  %v341_v33 = vmax.f32 %v295_v26, 0.0  ;;  %v364_v2 = vld [vmem:[%s1217_s3 + $0x78] sm:$0xff]  ;;  %v449_v15 = vpop.permute.xlu0 %448 }
  0xda   :  { %v304_v3 = vpop.f32.mrf.mxu0 }
  0xdb   :  { %v305_v21 = vadd.f32 %v304_v3, %v112_v6  ;;  %v344_v25 = vmax.f32 %v310_v18, 0.0  ;;  %v909_v3 = vmov 0.0  }
  0xdc   :  { %v808_v5 = vpop.f32.mrf.mxu0  ;;  %868 = vmatprep.subr.mxu0 %v909_v3  ;;  %900 = vmatprep.mubr.msk.f32.mxu0 %vm910_vm1, %v909_v3 }
  0xdd   :  { %v320_v12 = vadd.f32 %v808_v5, %v127_v60  ;;  %v343_v27 = vmax.f32 %v305_v21, 0.0  ;;  %v358_v60 = vld [vmem:[%s1217_s3 + $0x48] sm:$0xff]  ;;  %v439_v20 = vpop.permute.xlu0 %438 }
  0xde   :  { %v314_v7 = vpop.f32.mrf.mxu0 }
  0xdf   :  { %v315_v16 = vadd.f32 %v314_v7, %v122_v1  ;;  %v346_v19 = vmax.f32 %v320_v12, 0.0  ;;  %v363_v1 = vld [vmem:[%s1217_s3 + $0x70] sm:$0xff]  ;;  %v454_v12 = vpop.permute.xlu1 %453 }
  0xe0   :  { %v811_v8 = vpop.f32.mrf.mxu0 }
  0xe1   :  { %v330_v9 = vadd.f32 %v811_v8, %v137_v58  ;;  %v345_v22 = vmax.f32 %v315_v16, 0.0  ;;  %v356_v58 = vld [vmem:[%s1217_s3 + $0x38] sm:$0xff]  ;;  %v429_v26 = vpop.permute.xlu0 %428 }
  0xe2   :  { %v324_v11 = vpop.f32.mrf.mxu0 }
  0xe3   :  { %v348_v13 = vmax.f32 %v330_v9, 0.0  ;;  %v325_v14 = vadd.f32 %v324_v11, %v132_v63  ;;  %v361_v63 = vld [vmem:[%s1217_s3 + $0x60] sm:$0xff] }
  0xe5   :  { %v347_v17 = vmax.f32 %v325_v14, 0.0  ;;  %812 = vmatprep.subr.mxu1 %v348_v13  ;;  %v419_v36 = vpop.permute.xlu0 %418 }
  0xe6   :  { %813 = vmatpush3.msra.mxu1 %v348_v13 }
  0xe7   :  { %814 = vmatprep.subr.mxu1 %v347_v17 }
  0xe8   :  { %815 = vmatpush3.msra.mxu1 %v347_v17  ;;  %v444_v17 = vpop.permute.xlu1 %443 }
  0xe9   :  { %816 = vmatprep.subr.mxu1 %v346_v19  ;;  %v409_v44 = vpop.permute.xlu0 %408 }
  0xea   :  { %817 = vmatpush3.msra.mxu1 %v346_v19 }
  0xeb   :  { %818 = vmatprep.subr.mxu1 %v345_v22 }
  0xec   :  { %819 = vmatpush3.msra.mxu1 %v345_v22  ;;  %v434_v22 = vpop.permute.xlu1 %433 }
  0xed   :  { %820 = vmatprep.subr.mxu1 %v344_v25 }
  0xee   :  { %821 = vmatpush3.msra.mxu1 %v344_v25 }
  0xef   :  { %822 = vmatprep.subr.mxu1 %v343_v27 }
  0xf0   :  { %823 = vmatpush3.msra.mxu1 %v343_v27  ;;  %v424_v31 = vpop.permute.xlu1 %423 }
  0xf1   :  { %824 = vmatprep.subr.mxu1 %v342_v30 }
  0xf2   :  { %825 = vmatpush3.msra.mxu1 %v342_v30 }
  0xf3   :  { %826 = vmatprep.subr.mxu1 %v341_v33 }
  0xf4   :  { %827 = vmatpush3.msra.mxu1 %v341_v33  ;;  %v414_v39 = vpop.permute.xlu1 %413 }
  0xf5   :  { %828 = vmatprep.subr.mxu1 %v340_v35 }
  0xf6   :  { %829 = vmatpush3.msra.mxu1 %v340_v35 }
  0xf7   :  { %830 = vmatprep.subr.mxu1 %v339_v38 }
  0xf8   :  { %831 = vmatpush3.msra.mxu1 %v339_v38  ;;  %v404_v47 = vpop.permute.xlu1 %403 }
  0xf9   :  { %832 = vmatprep.subr.mxu1 %v338_v41 }
  0xfa   :  { %833 = vmatpush3.msra.mxu1 %v338_v41 }
  0xfb   :  { %834 = vmatprep.subr.mxu1 %v337_v43 }
  0xfc   :  { %835 = vmatpush3.msra.mxu1 %v337_v43 }
  0xfd   :  { %836 = vmatprep.subr.mxu1 %v336_v46 }
  0xfe   :  { %837 = vmatpush3.msra.mxu1 %v336_v46 }
  0xff   :  { %838 = vmatprep.subr.mxu1 %v335_v49 }
 0x100   :  { %839 = vmatpush3.msra.mxu1 %v335_v49 }
 0x101   :  { %840 = vmatprep.subr.mxu1 %v334_v50 }
 0x102   :  { %841 = vmatpush3.msra.mxu1 %v334_v50 }
 0x103   :  { %842 = vmatprep.subr.mxu1 %v333_v51 }
 0x104   :  { %843 = vmatpush3.msra.mxu1 %v333_v51 }
 0x105   :  { %845 = vmatmul.mubr.f32.vlgmr.msra.gmra.mxu1 %v350_v54  ;;  %v399_v54 = vpop.permute.xlu0 %398 }
 0x106   :  { %847 = vmatprep.mubr.f32.mxu1 %v351_v52 }
 0x109   :  { %848 = vmatmul.mubr.f32.gmra.mxu1 %v352_v53 }
 0x10a   :  { %850 = vmatprep.mubr.f32.mxu1 %v353_v55  ;;  %v394_v55 = vpop.permute.xlu1 %393 }
 0x10d   :  { %851 = vmatmul.mubr.f32.gmra.mxu1 %v354_v56 }
 0x10e   :  { %853 = vmatprep.mubr.f32.mxu1 %v355_v57 }
 0x111   :  { %854 = vmatmul.mubr.f32.gmra.mxu1 %v356_v58 }
 0x112   :  { %856 = vmatprep.mubr.f32.mxu1 %v357_v59 }
 0x115   :  { %857 = vmatmul.mubr.f32.gmra.mxu1 %v358_v60  ;;  %v389_v60 = vpop.permute.xlu0 %388 }
 0x116   :  { %859 = vmatprep.mubr.f32.mxu1 %v359_v61 }
 0x119   :  { %860 = vmatmul.mubr.f32.gmra.mxu1 %v360_v62 }
 0x11a   :  { %862 = vmatprep.mubr.f32.mxu1 %v361_v63  ;;  %v384_v63 = vpop.permute.xlu1 %383 }
 0x11d   :  { %863 = vmatmul.mubr.f32.gmra.mxu1 %v362_v0 }
 0x11e   :  { %865 = vmatprep.mubr.f32.mxu1 %v363_v1 }
 0x121   :  { %866 = vmatmul.mubr.f32.gmra.mxu1 %v364_v2 }
 0x1c5   :  { %v1179_v4 = vpop.f32.mrf.mxu1 }
 0x1c6   :  { %v533_v61 = vadd.f32 %v1179_v4, %v389_v60  ;;  %v622_v4 = vld [vmem:[%s1218_s5] sm:$0xff] }
 0x1c7   :  { %v1181_v5 = vpop.f32.mrf.mxu1 }
 0x1c8   :  { %v528_v0 = vadd.f32 %v1181_v5, %v384_v63  ;;  %v607_v2 = vmax.f32 %v533_v61, 0.0 }
 0x1c9   :  { %v1183_v6 = vpop.f32.mrf.mxu1 }
 0x1ca   :  { %v543_v56 = vadd.f32 %v1183_v6, %v399_v54  ;;  %v606_v6 = vmax.f32 %v528_v0, 0.0 }
 0x1cb   :  { %v1185_v7 = vpop.f32.mrf.mxu1 }
 0x1cc   :  { %v538_v58 = vadd.f32 %v1185_v7, %v394_v55  ;;  %v609_v62 = vmax.f32 %v543_v56, 0.0  ;;  %v627_v7 = vpop.permute.xlu0 %626 }
 0x1cd   :  { %v852_v8 = vpop.f32.mrf.mxu1 }
 0x1ce   :  { %v553_v50 = vadd.f32 %v852_v8, %v409_v44  ;;  %v608_v1 = vmax.f32 %v538_v58, 0.0 }
 0x1cf   :  { %v547_v9 = vpop.f32.mrf.mxu1 }
 0x1d0   :  { %v548_v52 = vadd.f32 %v547_v9, %v404_v47  ;;  %v611_v57 = vmax.f32 %v553_v50, 0.0 }
 0x1d1   :  { %v855_v11 = vpop.f32.mrf.mxu1 }
 0x1d2   :  { %v563_v45 = vadd.f32 %v855_v11, %v419_v36  ;;  %v610_v59 = vmax.f32 %v548_v52, 0.0 }
 0x1d3   :  { %v557_v13 = vpop.f32.mrf.mxu1 }
 0x1d4   :  { %v558_v48 = vadd.f32 %v557_v13, %v414_v39  ;;  %v613_v51 = vmax.f32 %v563_v45, 0.0 }
 0x1d5   :  { %v858_v14 = vpop.f32.mrf.mxu1 }
 0x1d6   :  { %v573_v40 = vadd.f32 %v858_v14, %v429_v26  ;;  %v612_v53 = vmax.f32 %v558_v48, 0.0 }
 0x1d7   :  { %v567_v16 = vpop.f32.mrf.mxu1 }
 0x1d8   :  { %v568_v42 = vadd.f32 %v567_v16, %v424_v31  ;;  %v615_v46 = vmax.f32 %v573_v40, 0.0 }
 0x1d9   :  { %v861_v18 = vpop.f32.mrf.mxu1 }
 0x1da   :  { %v583_v34 = vadd.f32 %v861_v18, %v439_v20  ;;  %v614_v49 = vmax.f32 %v568_v42, 0.0 }
 0x1db   :  { %v577_v19 = vpop.f32.mrf.mxu1 }
 0x1dc   :  { %v578_v37 = vadd.f32 %v577_v19, %v434_v22  ;;  %v617_v41 = vmax.f32 %v583_v34, 0.0 }
 0x1dd   :  { %v864_v21 = vpop.f32.mrf.mxu1 }
 0x1de   :  { %v593_v28 = vadd.f32 %v864_v21, %v449_v15  ;;  %v616_v43 = vmax.f32 %v578_v37, 0.0 }
 0x1df   :  { %v587_v23 = vpop.f32.mrf.mxu1 }
 0x1e0   :  { %v588_v32 = vadd.f32 %v587_v23, %v444_v17  ;;  %v619_v35 = vmax.f32 %v593_v28, 0.0 }
 0x1e1   :  { %v867_v24 = vpop.f32.mrf.mxu1 }
 0x1e2   :  { %v603_v25 = vadd.f32 %v867_v24, %v459_v10  ;;  %v618_v38 = vmax.f32 %v588_v32, 0.0 }
 0x1e3   :  { %v597_v27 = vpop.f32.mrf.mxu1 }
 0x1e4   :  { %v621_v29 = vmax.f32 %v603_v25, 0.0  ;;  %v598_v30 = vadd.f32 %v597_v27, %v454_v12 }
 0x1e6   :  { %v620_v33 = vmax.f32 %v598_v30, 0.0  ;;  %869 = vmatpush3.msra.mxu0 %v621_v29 }
 0x1e7   :  { %870 = vmatprep.subr.mxu0 %v909_v3 }
 0x1e8   :  { %871 = vmatpush3.msra.mxu0 %v620_v33 }
 0x1e9   :  { %872 = vmatprep.subr.mxu0 %v909_v3 }
 0x1ea   :  { %873 = vmatpush3.msra.mxu0 %v619_v35 }
 0x1eb   :  { %874 = vmatprep.subr.mxu0 %v909_v3 }
 0x1ec   :  { %875 = vmatpush3.msra.mxu0 %v618_v38 }
 0x1ed   :  { %876 = vmatprep.subr.mxu0 %v909_v3 }
 0x1ee   :  { %877 = vmatpush3.msra.mxu0 %v617_v41 }
 0x1ef   :  { %878 = vmatprep.subr.mxu0 %v909_v3 }
 0x1f0   :  { %879 = vmatpush3.msra.mxu0 %v616_v43 }
 0x1f1   :  { %880 = vmatprep.subr.mxu0 %v909_v3 }
 0x1f2   :  { %881 = vmatpush3.msra.mxu0 %v615_v46 }
 0x1f3   :  { %882 = vmatprep.subr.mxu0 %v909_v3 }
 0x1f4   :  { %883 = vmatpush3.msra.mxu0 %v614_v49 }
 0x1f5   :  { %884 = vmatprep.subr.mxu0 %v909_v3 }
 0x1f6   :  { %885 = vmatpush3.msra.mxu0 %v613_v51 }
 0x1f7   :  { %886 = vmatprep.subr.mxu0 %v909_v3 }
 0x1f8   :  { %887 = vmatpush3.msra.mxu0 %v612_v53 }
 0x1f9   :  { %888 = vmatprep.subr.mxu0 %v909_v3 }
 0x1fa   :  { %889 = vmatpush3.msra.mxu0 %v611_v57 }
 0x1fb   :  { %890 = vmatprep.subr.mxu0 %v909_v3 }
 0x1fc   :  { %891 = vmatpush3.msra.mxu0 %v610_v59 }
 0x1fd   :  { %892 = vmatprep.subr.mxu0 %v909_v3 }
 0x1fe   :  { %893 = vmatpush3.msra.mxu0 %v609_v62 }
 0x1ff   :  { %894 = vmatprep.subr.mxu0 %v909_v3 }
 0x200   :  { %895 = vmatpush3.msra.mxu0 %v608_v1 }
 0x201   :  { %896 = vmatprep.subr.mxu0 %v909_v3 }
 0x202   :  { %897 = vmatpush3.msra.mxu0 %v607_v2 }
 0x203   :  { %898 = vmatprep.subr.mxu0 %v909_v3 }
 0x204   :  { %899 = vmatpush3.msra.mxu0 %v606_v6 }
 0x205   :  { %901 = vmatmul.mubr.f32.vlgmr.msra.gmra.mxu0 %v622_v4 }
 0x2c5   :  { %v695_v5 = vpop.f32.mrf.mxu0 }
 0x2c6   :  { %v696_v8 = vadd.f32 %v695_v5, %v627_v7 }
 0x2c7   :  { %v902_v9 = vpop.f32.mrf.mxu0 }
 0x2c8   :  { %699 = vst [vmem:[%s1219_s7] sm:$0xff] %v696_v8 }

</bundles_post_ra>
